<compile_context>
chip_gen: v7x
topology: tpu7x:2x2x1
jax: 0.10.0
libtpu: 0.0.40
codegen_flags: <defaults>
</compile_context>

<pallas_src>
import functools
import math

import jax
import jax.numpy as jnp
from jax.experimental import pallas as pl
from jax.experimental.pallas import tpu as pltpu


# ----------------------------------------------------------------------------
# helpers
# ----------------------------------------------------------------------------
def _gelu(x):
    # tanh-approximation GELU (used in both kernel and reference so the
    # self-check compares identical math).
    return 0.5 * x * (1.0 + jnp.tanh(0.7978845608028654 * (x + 0.044715 * x * x * x)))


def _pick_tn(n):
    # largest lane tile that divides N while keeping >= 2 grid steps
    for t in (512, 256, 128):
        if n % t == 0 and n // t >= 2:
            return t
    return n


# ----------------------------------------------------------------------------
# Pallas kernel: y_tile = act(x @ W_tile + b_tile), full-K blocks
# ----------------------------------------------------------------------------
def _linear_kernel(x_ref, w_ref, b_ref, o_ref, *, activation):
    out = jnp.dot(x_ref[...], w_ref[...], preferred_element_type=jnp.float32)
    out = out + b_ref[...]
    if activation == "gelu":
        out = _gelu(out)
    elif activation == "tanh":
        out = jnp.tanh(out)
    o_ref[...] = out.astype(o_ref.dtype)


def linear_pallas(x, w, b, *, activation="none", out_dtype=jnp.bfloat16):
    """y = act(x @ w + b).  x: (M, K) bf16, w: (K, N) bf16, b: (N,) f32."""
    M, K = x.shape
    Kw, N = w.shape
    assert K == Kw and b.shape == (N,), (x.shape, w.shape, b.shape)
    assert M % 8 == 0 and K % 128 == 0 and N % 128 == 0, (M, K, N)

    tn = _pick_tn(N)
    grid = (N // tn,)
    kernel = functools.partial(_linear_kernel, activation=activation)
    return pl.pallas_call(
        kernel,
        out_shape=jax.ShapeDtypeStruct((M, N), out_dtype),
        grid_spec=pltpu.PrefetchScalarGridSpec(
            num_scalar_prefetch=0,
            grid=grid,
            in_specs=[
                # x: one full-K block, constant index -> DMA'd once per call
                pl.BlockSpec((M, K), lambda j: (0, 0)),
                # W: full-K x tn tile streamed along N
                pl.BlockSpec((K, tn), lambda j: (0, j)),
                # bias tile
                pl.BlockSpec((1, tn), lambda j: (0, j)),
            ],
            out_specs=pl.BlockSpec((M, tn), lambda j: (0, j)),
        ),
        compiler_params=pltpu.CompilerParams(
            dimension_semantics=("parallel",),
        ),
    )(x, w, b.reshape(1, N))


def _linear_ref(x, w, b, *, activation="none", out_dtype=jnp.bfloat16):
    out = jnp.dot(x, w, preferred_element_type=jnp.float32) + b
    if activation == "gelu":
        out = _gelu(out)
    elif activation == "tanh":
        out = jnp.tanh(out)
    return out.astype(out_dtype)


# ----------------------------------------------------------------------------
# Pallas kernel: fused softmax(Q K^T / sqrt(d)) V per (batch, head)
# ----------------------------------------------------------------------------
def _attn_kernel(q_ref, k_ref, v_ref, o_ref, *, scale):
    s = jnp.dot(q_ref[...], k_ref[...].T, preferred_element_type=jnp.float32) * scale
    s = s - jnp.max(s, axis=-1, keepdims=True)
    p = jnp.exp(s)
    p = p / jnp.sum(p, axis=-1, keepdims=True)
    o = jnp.dot(p.astype(v_ref.dtype), v_ref[...], preferred_element_type=jnp.float32)
    o_ref[...] = o.astype(o_ref.dtype)


def attention_pallas(q, k, v):
    """q, k, v: (B, nh, S, hd) bf16 -> (B, nh, S, hd) bf16."""
    B, nh, S, hd = q.shape
    scale = 1.0 / math.sqrt(hd)
    spec = pl.BlockSpec((None, None, S, hd), lambda b, h: (b, h, 0, 0))
    kernel = functools.partial(_attn_kernel, scale=scale)
    return pl.pallas_call(
        kernel,
        out_shape=jax.ShapeDtypeStruct((B, nh, S, hd), jnp.bfloat16),
        grid_spec=pltpu.PrefetchScalarGridSpec(
            num_scalar_prefetch=0,
            grid=(B, nh),
            in_specs=[spec, spec, spec],
            out_specs=spec,
        ),
        compiler_params=pltpu.CompilerParams(
            dimension_semantics=("parallel", "parallel"),
        ),
    )(q, k, v)


def _attention_ref(q, k, v):
    hd = q.shape[-1]
    scale = 1.0 / math.sqrt(hd)
    s = jnp.einsum("bhqd,bhkd->bhqk", q, k, preferred_element_type=jnp.float32) * scale
    s = s - jnp.max(s, axis=-1, keepdims=True)
    p = jnp.exp(s)
    p = p / jnp.sum(p, axis=-1, keepdims=True)
    o = jnp.einsum("bhqk,bhkd->bhqd", p.astype(v.dtype), v,
                   preferred_element_type=jnp.float32)
    return o.astype(jnp.bfloat16)


# ----------------------------------------------------------------------------
# Pallas kernel: fused residual add + LayerNorm (post-LN, BERT style)
# ----------------------------------------------------------------------------
def _add_ln_kernel(x_ref, r_ref, g_ref, b_ref, o_ref, *, eps):
    v = x_ref[...].astype(jnp.float32) + r_ref[...].astype(jnp.float32)
    mu = jnp.mean(v, axis=-1, keepdims=True)
    d = v - mu
    var = jnp.mean(d * d, axis=-1, keepdims=True)
    y = d * jax.lax.rsqrt(var + eps)
    y = y * g_ref[...] + b_ref[...]
    o_ref[...] = y.astype(o_ref.dtype)


def add_layernorm_pallas(x, r, gamma, beta, *, eps=1e-12, out_dtype=jnp.bfloat16):
    M, H = x.shape
    assert r.shape == (M, H) and M % 8 == 0 and H % 128 == 0, (x.shape, r.shape)
    kernel = functools.partial(_add_ln_kernel, eps=eps)
    return pl.pallas_call(
        kernel,
        out_shape=jax.ShapeDtypeStruct((M, H), out_dtype),
        grid_spec=pltpu.PrefetchScalarGridSpec(
            num_scalar_prefetch=0,
            grid=(1,),
            in_specs=[
                pl.BlockSpec((M, H), lambda i: (0, 0)),
                pl.BlockSpec((M, H), lambda i: (0, 0)),
                pl.BlockSpec((1, H), lambda i: (0, 0)),
                pl.BlockSpec((1, H), lambda i: (0, 0)),
            ],
            out_specs=pl.BlockSpec((M, H), lambda i: (0, 0)),
        ),
    )(x, r, gamma.reshape(1, H), beta.reshape(1, H))


def _add_layernorm_ref(x, r, gamma, beta, *, eps=1e-12, out_dtype=jnp.bfloat16):
    v = x.astype(jnp.float32) + r.astype(jnp.float32)
    mu = jnp.mean(v, axis=-1, keepdims=True)
    d = v - mu
    var = jnp.mean(d * d, axis=-1, keepdims=True)
    y = d * jax.lax.rsqrt(var + eps) * gamma + beta
    return y.astype(out_dtype)


# ----------------------------------------------------------------------------
# DNABERT (BERT encoder + pooler) driving the Pallas kernels
# ----------------------------------------------------------------------------
class DNABERTPallas:
    def __init__(self, vocab_size=4101, hidden=256, num_layers=2, num_heads=4,
                 intermediate=1024, max_pos=512, type_vocab=2, key=None):
        assert hidden % num_heads == 0 and hidden % 128 == 0
        assert intermediate % 128 == 0
        self.vocab_size = vocab_size
        self.hidden = hidden
        self.num_layers = num_layers
        self.num_heads = num_heads
        self.intermediate = intermediate
        self.embed_dims = hidden  # mirrors self.model.config.hidden_size

        if key is None:
            key = jax.random.PRNGKey(0)

        def normal(k, shape):
            return 0.02 * jax.random.normal(k, shape, jnp.float32)

        keys = iter(jax.random.split(key, 8 + 8 * num_layers))
        p = {
            "word_emb": normal(next(keys), (vocab_size, hidden)),
            "pos_emb": normal(next(keys), (max_pos, hidden)),
            "type_emb": normal(next(keys), (type_vocab, hidden)),
            "emb_ln_g": jnp.ones((hidden,), jnp.float32),
            "emb_ln_b": jnp.zeros((hidden,), jnp.float32),
            "w_pool": normal(next(keys), (hidden, hidden)).astype(jnp.bfloat16),
            "b_pool": jnp.zeros((hidden,), jnp.float32),
            "layers": [],
        }
        for _ in range(num_layers):
            layer = {
                "w_qkv": normal(next(keys), (hidden, 3 * hidden)).astype(jnp.bfloat16),
                "b_qkv": jnp.zeros((3 * hidden,), jnp.float32),
                "w_o": normal(next(keys), (hidden, hidden)).astype(jnp.bfloat16),
                "b_o": jnp.zeros((hidden,), jnp.float32),
                "ln1_g": jnp.ones((hidden,), jnp.float32),
                "ln1_b": jnp.zeros((hidden,), jnp.float32),
                "w_ff1": normal(next(keys), (hidden, intermediate)).astype(jnp.bfloat16),
                "b_ff1": jnp.zeros((intermediate,), jnp.float32),
                "w_ff2": normal(next(keys), (intermediate, hidden)).astype(jnp.bfloat16),
                "b_ff2": jnp.zeros((hidden,), jnp.float32),
                "ln2_g": jnp.ones((hidden,), jnp.float32),
                "ln2_b": jnp.zeros((hidden,), jnp.float32),
            }
            p["layers"].append(layer)
        self.params = p

    # ----- shared orchestration (same flow for Pallas kernels and reference) -
    def _forward(self, seq, linear_fn, attn_fn, add_ln_fn):
        p = self.params
        B, S = seq.shape
        H, nh = self.hidden, self.num_heads
        hd = H // nh
        M = B * S
        assert M % 8 == 0, "batch*seq_len must be a multiple of 8 for TPU tiling"

        # Embeddings (gather kept in JAX).  TODO(synk): embedding-table gather
        # has no clean rectangular BlockSpec; could use pl.Element prefetch.
        word = jnp.take(p["word_emb"], seq, axis=0)            # (B, S, H)
        pos = p["pos_emb"][:S][None, :, :]                     # (1, S, H)
        typ = jnp.broadcast_to(p["type_emb"][0][None, None, :], (B, S, H))
        x = (word + pos).reshape(M, H)
        h = add_ln_fn(x, typ.reshape(M, H), p["emb_ln_g"], p["emb_ln_b"])

        # TODO(synk): dropout omitted (inference-mode forward).
        for layer in p["layers"]:
            qkv = linear_fn(h, layer["w_qkv"], layer["b_qkv"],
                            activation="none", out_dtype=jnp.bfloat16)
            qkv = qkv.reshape(B, S, 3, nh, hd).transpose(2, 0, 3, 1, 4)
            q, k, v = qkv[0], qkv[1], qkv[2]                   # (B, nh, S, hd)
            ctx = attn_fn(q, k, v)                             # (B, nh, S, hd)
            ctx = ctx.transpose(0, 2, 1, 3).reshape(M, H)
            attn_out = linear_fn(ctx, layer["w_o"], layer["b_o"],
                                 activation="none", out_dtype=jnp.bfloat16)
            h = add_ln_fn(h, attn_out, layer["ln1_g"], layer["ln1_b"])

            ff = linear_fn(h, layer["w_ff1"], layer["b_ff1"],
                           activation="gelu", out_dtype=jnp.bfloat16)
            ff = linear_fn(ff, layer["w_ff2"], layer["b_ff2"],
                           activation="none", out_dtype=jnp.bfloat16)
            h = add_ln_fn(h, ff, layer["ln2_g"], layer["ln2_b"])

        # Pooler: tanh(Linear(hidden state of [CLS]))  ->  pooler_output
        cls = h.reshape(B, S, H)[:, 0, :]                      # (B, H)
        pad = (-B) % 8
        if pad:
            cls = jnp.pad(cls, ((0, pad), (0, 0)))
        pooled = linear_fn(cls, p["w_pool"], p["b_pool"],
                           activation="tanh", out_dtype=jnp.float32)
        return pooled[:B]

    def forward(self, seq):
        return self._forward(seq, linear_pallas, attention_pallas,
                             add_layernorm_pallas)

    def forward_ref(self, seq):
        return self._forward(seq, _linear_ref, _attention_ref,
                             _add_layernorm_ref)


if __name__ == "__main__":
    # Small, deterministic demo config (DNA_bert_6 is hidden=768 / 12 layers /
    # 12 heads / vocab=4101; reduced here for a fast self-contained run).
    vocab_size = 4101
    hidden = 256
    num_layers = 2
    num_heads = 4
    intermediate = 1024
    batch, seq_len = 2, 8

    model = DNABERTPallas(vocab_size=vocab_size, hidden=hidden,
                          num_layers=num_layers, num_heads=num_heads,
                          intermediate=intermediate,
                          key=jax.random.PRNGKey(42))

    # seq: token ids (batch, seq_len)
    seq = jax.random.randint(jax.random.PRNGKey(0), (batch, seq_len), 0,
                             vocab_size, dtype=jnp.int32)

    out = jax.block_until_ready(model.forward(seq))
    assert out.shape == (batch, hidden), out.shape

    ref = jax.block_until_ready(model.forward_ref(seq))
    max_err = float(jnp.max(jnp.abs(out - ref)))
    assert jnp.allclose(out, ref, atol=3e-2, rtol=3e-2), max_err

    print("KERNEL_OK")
</pallas_src>

<mosaic_0001>
module attributes {stable_mosaic.version = 11 : i64} {
  func.func @_add_ln_kernel(%arg0: i32, %arg1: memref<16x256xf32, #tpu.memory_space<vmem>>, %arg2: memref<16x256xf32, #tpu.memory_space<vmem>>, %arg3: memref<1x256xf32, #tpu.memory_space<vmem>>, %arg4: memref<1x256xf32, #tpu.memory_space<vmem>>, %arg5: memref<16x256xbf16, #tpu.memory_space<vmem>>) attributes {dimension_semantics = [#tpu.dimension_semantics<arbitrary>], iteration_bounds = array<i64: 1>, scalar_prefetch = 0 : i64, scratch_operands = 0 : i64, tpu.core_type = #tpu.core_type<tc>, window_params = [{pipeline_mode = #tpu.pipeline_mode<synchronous>, transform_indices = @transform_0, window_bounds = array<i64: 16, 256>}, {pipeline_mode = #tpu.pipeline_mode<synchronous>, transform_indices = @transform_1, window_bounds = array<i64: 16, 256>}, {pipeline_mode = #tpu.pipeline_mode<synchronous>, transform_indices = @transform_2, window_bounds = array<i64: 1, 256>}, {pipeline_mode = #tpu.pipeline_mode<synchronous>, transform_indices = @transform_3, window_bounds = array<i64: 1, 256>}, {pipeline_mode = #tpu.pipeline_mode<synchronous>, transform_indices = @transform_4, window_bounds = array<i64: 16, 256>}]} {
    %c0 = arith.constant 0 : index
    %c0_0 = arith.constant 0 : index
    %0 = vector.load %arg1[%c0, %c0_0] : memref<16x256xf32, #tpu.memory_space<vmem>>, vector<16x256xf32>
    %c0_1 = arith.constant 0 : index
    %c0_2 = arith.constant 0 : index
    %1 = vector.load %arg2[%c0_1, %c0_2] : memref<16x256xf32, #tpu.memory_space<vmem>>, vector<16x256xf32>
    %2 = arith.addf %0, %1 : vector<16x256xf32>
    %cst = arith.constant dense<0.000000e+00> : vector<16xf32>
    %3 = vector.multi_reduction <add>, %2, %cst [1] : vector<16x256xf32> to vector<16xf32>
    %4 = vector.shape_cast %3 : vector<16xf32> to vector<16x1xf32>
    %cst_3 = arith.constant 2.560000e+02 : f32
    %5 = vector.broadcast %cst_3 : f32 to vector<16x1xf32>
    %6 = arith.divf %4, %5 : vector<16x1xf32>
    %7 = vector.broadcast %6 : vector<16x1xf32> to vector<16x256xf32>
    %8 = arith.subf %2, %7 : vector<16x256xf32>
    %9 = arith.mulf %8, %8 : vector<16x256xf32>
    %cst_4 = arith.constant dense<0.000000e+00> : vector<16xf32>
    %10 = vector.multi_reduction <add>, %9, %cst_4 [1] : vector<16x256xf32> to vector<16xf32>
    %11 = vector.shape_cast %10 : vector<16xf32> to vector<16x1xf32>
    %cst_5 = arith.constant 2.560000e+02 : f32
    %12 = vector.broadcast %cst_5 : f32 to vector<16x1xf32>
    %13 = arith.divf %11, %12 : vector<16x1xf32>
    %cst_6 = arith.constant 9.99999996E-13 : f32
    %14 = vector.broadcast %cst_6 : f32 to vector<16x1xf32>
    %15 = arith.addf %13, %14 : vector<16x1xf32>
    %16 = math.rsqrt %15 : vector<16x1xf32>
    %17 = vector.broadcast %16 : vector<16x1xf32> to vector<16x256xf32>
    %18 = arith.mulf %8, %17 : vector<16x256xf32>
    %c0_7 = arith.constant 0 : index
    %c0_8 = arith.constant 0 : index
    %19 = vector.load %arg3[%c0_7, %c0_8] : memref<1x256xf32, #tpu.memory_space<vmem>>, vector<1x256xf32>
    %20 = vector.broadcast %19 : vector<1x256xf32> to vector<16x256xf32>
    %21 = arith.mulf %18, %20 : vector<16x256xf32>
    %c0_9 = arith.constant 0 : index
    %c0_10 = arith.constant 0 : index
    %22 = vector.load %arg4[%c0_9, %c0_10] : memref<1x256xf32, #tpu.memory_space<vmem>>, vector<1x256xf32>
    %23 = vector.broadcast %22 : vector<1x256xf32> to vector<16x256xf32>
    %24 = arith.addf %21, %23 : vector<16x256xf32>
    %25 = arith.truncf %24 : vector<16x256xf32> to vector<16x256xbf16>
    %c0_11 = arith.constant 0 : index
    %c0_12 = arith.constant 0 : index
    %26 = vector.load %arg5[%c0_11, %c0_12] : memref<16x256xbf16, #tpu.memory_space<vmem>>, vector<16x256xbf16>
    tpu.vector_store %arg5[%c0_11, %c0_12], %25 {strides = array<i32>} : memref<16x256xbf16, #tpu.memory_space<vmem>>, vector<16x256xbf16>,
    return
  }
  func.func @transform_0(%arg0: i32) -> (i32, i32) {
    %c0_i32 = arith.constant 0 : i32
    %c0_i32_0 = arith.constant 0 : i32
    %c0_i32_1 = arith.constant 0 : i32
    return %c0_i32, %c0_i32_0 : i32, i32
  }
  func.func @transform_1(%arg0: i32) -> (i32, i32) {
    %c0_i32 = arith.constant 0 : i32
    %c0_i32_0 = arith.constant 0 : i32
    %c0_i32_1 = arith.constant 0 : i32
    return %c0_i32, %c0_i32_0 : i32, i32
  }
  func.func @transform_2(%arg0: i32) -> (i32, i32) {
    %c0_i32 = arith.constant 0 : i32
    %c0_i32_0 = arith.constant 0 : i32
    %c0_i32_1 = arith.constant 0 : i32
    return %c0_i32, %c0_i32_0 : i32, i32
  }
  func.func @transform_3(%arg0: i32) -> (i32, i32) {
    %c0_i32 = arith.constant 0 : i32
    %c0_i32_0 = arith.constant 0 : i32
    %c0_i32_1 = arith.constant 0 : i32
    return %c0_i32, %c0_i32_0 : i32, i32
  }
  func.func @transform_4(%arg0: i32) -> (i32, i32) {
    %c0_i32 = arith.constant 0 : i32
    %c0_i32_0 = arith.constant 0 : i32
    %c0_i32_1 = arith.constant 0 : i32
    return %c0_i32, %c0_i32_0 : i32, i32
  }
}

</mosaic_0001>

<bundles_post_ra>
// kernel: tpu_custom_call.1
= control target key start
LH: loop header
LB: loop body
LE: loop exit
PB: predicated region body
PF: predicated region fallthrough
CT: control target
= control target key end

     0   :  { %9 = vsyncpa [#allocation3], 0  ;;  %s316_s0 = inlined_call_operand.hbm [shape: f32[16,256], index: 0, kind: input, shape index: {}]   ;;  %s317_s1 = inlined_call_operand.hbm [shape: f32[16,256], index: 1, kind: input, shape index: {}]   ;;  %s318_s2 = inlined_call_operand.vmem [shape: f32[1,256], index: 2, kind: input, shape index: {}]   ;;  %s319_s3 = inlined_call_operand.vmem [shape: f32[1,256], index: 3, kind: input, shape index: {}]   ;;  %s320_s4 = inlined_call_operand.hbm [shape: bf16[16,256], index: 4, kind: output, shape index: {}]  }
   0x1   :  { %10 = vsyncpa [#allocation6], 0 }
   0x2   :  { %11 = vsyncpa [#allocation4], 0  ;;  %s242_s15 = smov [#allocation2]   ;;  %s170_s19 = scalar_lea.hbm %s316_s0, 512 }
   0x3   :  { %s17_s16 = sshll.u32 %s242_s15, 4  ;;  %p171_p0 = scmp.ne.s32.totalorder %s316_s0, %s170_s19  ;;  %s18_s16 = int_to_ptr.vmem [resolvable:$true] %s17_s16 }
   0x4   :  { %p174_p1 = scmp.lt.u32.totalorder %s170_s19, %s316_s0 }
   0x6   :  { %p176_p2 = pnand %p174_p1, %p171_p0 }
   0x8   :  { %179 = shalt.err (!%p176_p2)
}
   0x9   :  { %s180_s24 = scalar_lea.vmem %s18_s16, 512  ;;  %p185_p4 = scmp.lt.s32.totalorder %s18_s16, %s18_s16 }
   0xa   :  { %p181_p3 = scmp.ne.s32.totalorder %s18_s16, %s180_s24  ;;  %p186_p5 = scmp.lt.s32.totalorder %s180_s24, %s180_s24 }
   0xc   :  { %p187_p6 = por %p186_p5, %p185_p4 }
   0xe   :  { %p188_p7 = pnand %p187_p6, %p181_p3 }
  0x10   :  { %191 = shalt.err (!%p188_p7)
}
  0x11   :  { %s243_s25 = smov 256   ;;  %s244_s26 = smov 16  }
  0x12   :  { %23 = dma.hbm_to_vmem [thread:$0]  %s316_s0, 512, %s18_s16, [#allocation3], %s243_s25, %s243_s25, %s244_s26  }
  0x13   :  { %s245_s29 = smov [#allocation5]   ;;  %s192_s7 = scalar_lea.hbm %s317_s1, 512 }
  0x14   :  { %s29_s30 = sshll.u32 %s245_s29, 4  ;;  %p193_p8 = scmp.ne.s32.totalorder %s317_s1, %s192_s7  ;;  %s30_s30 = int_to_ptr.vmem [resolvable:$true] %s29_s30 }
  0x15   :  { %p196_p9 = scmp.lt.u32.totalorder %s192_s7, %s317_s1 }
  0x17   :  { %p198_p10 = pnand %p196_p9, %p193_p8 }
  0x19   :  { %201 = shalt.err (!%p198_p10)
}
  0x1a   :  { %s202_s12 = scalar_lea.vmem %s30_s30, 512  ;;  %p207_p12 = scmp.lt.s32.totalorder %s30_s30, %s30_s30 }
  0x1b   :  { %p203_p11 = scmp.ne.s32.totalorder %s30_s30, %s202_s12  ;;  %p208_p13 = scmp.lt.s32.totalorder %s202_s12, %s202_s12 }
  0x1d   :  { %p209_p0 = por %p208_p13, %p207_p12 }
  0x1f   :  { %p210_p1 = pnand %p209_p0, %p203_p11 }
  0x21   :  { %213 = shalt.err (!%p210_p1)
}
  0x22   :  { %35 = dma.hbm_to_vmem [thread:$0]  %s317_s1, 512, %s30_s30, [#allocation6], %s243_s25, %s243_s25, %s244_s26  }
  0x23   :  { %236 = dma.done.wait [#allocation3], 512  }
  0x24   :  { %237 = vsyncadd [#allocation3], 4294966784 }
  0x25   :  { %238 = dma.done.wait [#allocation6], 512  }
  0x26   :  { %239 = vsyncadd [#allocation6], 4294966784  ;;  %v46_v0 = vld [vmem:[#allocation2] sm:$0xff]  ;;  %v47_v1 = vld [vmem:[#allocation2 + $0x8] sm:$0xff]  ;;  %v93_v30 = vlaneseq }
  0x27   :  { %v50_v2 = vld [vmem:[#allocation5] sm:$0xff]  ;;  %v51_v3 = vld [vmem:[#allocation5 + $0x8] sm:$0xff]  ;;  %v48_v5 = vld [vmem:[#allocation2 + $0x10] sm:$0xff] }
  0x28   :  { %v54_v4 = vadd.f32 %v50_v2, %v46_v0  ;;  %v49_v6 = vld [vmem:[#allocation2 + $0x18] sm:$0xff]  ;;  %v55_v7 = vadd.f32 %v51_v3, %v47_v1  ;;  %v52_v8 = vld [vmem:[#allocation5 + $0x10] sm:$0xff]  ;;  %v94_v34 = vshrl.u32 %v93_v30, 7  ;;  %v91_v38 = vld [vmem:[%s318_s2] sm:$0x3]  ;;  %s246_s2 = smov [#allocation7]  }
  0x29   :  { %v53_v9 = vld [vmem:[#allocation5 + $0x18] sm:$0xff]  ;;  %v56_v10 = vadd.f32 %v52_v8, %v48_v5  ;;  %v107_v39 = vld [vmem:[%s319_s3] sm:$0x3]  ;;  %s142_s17 = sshll.u32 %s246_s2, 4  ;;  %s143_s17 = int_to_ptr.vmem [resolvable:$true] %s142_s17 }
  0x2a   :  { %v57_v11 = vadd.f32 %v53_v9, %v49_v6  ;;  %v58_v12 = vadd.f32 %v55_v7, %v54_v4  ;;  %v95_v36 = vsub.s32 0, %v94_v34  ;;  %v99_v37 = vsub.s32 1, %v94_v34  ;;  %s214_s3 = scalar_lea.vmem %s143_s17, 256  ;;  %p219_p3 = scmp.lt.s32.totalorder %s143_s17, %s143_s17 }
  0x2b   :  { %p215_p2 = scmp.ne.s32.totalorder %s143_s17, %s214_s3  ;;  %p220_p4 = scmp.lt.s32.totalorder %s214_s3, %s214_s3 }
  0x2c   :  { %59 = vadd.xlane.f32.xlu0 %v58_v12  ;;  %v61_v13 = vadd.f32 %v57_v11, %v56_v10  ;;  %v96_v40 = vrot.slane %v91_v38, %v95_v36  ;;  %v100_v41 = vrot.slane %v91_v38, %v99_v37  ;;  %v112_v45 = vrot.slane %v107_v39, %v95_v36 }
  0x2d   :  { %v116_v46 = vrot.slane %v107_v39, %v99_v37  ;;  %p221_p5 = por %p220_p4, %p219_p3 }
  0x2f   :  { %p222_p6 = pnand %p221_p5, %p215_p2 }
  0x30   :  { %62 = vadd.xlane.f32.xlu0 %v61_v13 }
  0xb9   :  { %v60_v14 = vpop.xlane.xlu0 %59 }
  0xba   :  { %v65_v15 = vmul.f32 0.00390625, %v60_v14 }
  0xbc   :  { %v67_v16 = vsub.f32 %v54_v4, %v65_v15  ;;  %v68_v17 = vsub.f32 %v55_v7, %v65_v15 }
  0xbd   :  { %v63_v18 = vpop.xlane.xlu0 %62 }
  0xbe   :  { %v66_v19 = vmul.f32 0.00390625, %v63_v18  ;;  %v71_v20 = vmul.f32 %v67_v16, %v67_v16  ;;  %v72_v21 = vmul.f32 %v68_v17, %v68_v17 }
  0xc0   :  { %v69_v22 = vsub.f32 %v56_v10, %v66_v19  ;;  %v70_v23 = vsub.f32 %v57_v11, %v66_v19  ;;  %v75_v24 = vadd.f32 %v72_v21, %v71_v20 }
  0xc2   :  { %76 = vadd.xlane.f32.xlu1 %v75_v24  ;;  %v73_v25 = vmul.f32 %v69_v22, %v69_v22  ;;  %v74_v26 = vmul.f32 %v70_v23, %v70_v23 }
  0xc4   :  { %v78_v27 = vadd.f32 %v74_v26, %v73_v25 }
  0xc6   :  { %79 = vadd.xlane.f32.xlu1 %v78_v27 }
 0x14f   :  { %v77_v28 = vpop.xlane.xlu1 %76 }
 0x150   :  { %v81_v29 = vmul.f32 0.00390625, %v77_v28 }
 0x152   :  { %v83_v31 = vadd.f32 1e-12, %v81_v29 }
 0x153   :  { %v80_v32 = vpop.xlane.xlu1 %79 }
 0x154   :  { %166 = vrsqrt.f32 %v83_v31  ;;  %v82_v33 = vmul.f32 0.00390625, %v80_v32 }
 0x156   :  { %v84_v35 = vadd.f32 1e-12, %v82_v33 }
 0x158   :  { %168 = vrsqrt.f32 %v84_v35 }
 0x15e   :  { %v167_v42 = vpop.eup %166 }
 0x15f   :  { %v87_v43 = vmul.f32 %v167_v42, %v67_v16  ;;  %v88_v44 = vmul.f32 %v167_v42, %v68_v17 }
 0x161   :  { %v103_v47 = vmul.f32 %v96_v40, %v87_v43  ;;  %v104_v48 = vmul.f32 %v100_v41, %v88_v44 }
 0x162   :  { %v169_v49 = vpop.eup %168 }
 0x163   :  { %v89_v50 = vmul.f32 %v169_v49, %v69_v22  ;;  %v90_v51 = vmul.f32 %v169_v49, %v70_v23  ;;  %v119_v52 = vadd.f32 %v112_v45, %v103_v47  ;;  %v120_v53 = vadd.f32 %v116_v46, %v104_v48 }
 0x165   :  { %v105_v54 = vmul.f32 %v96_v40, %v89_v50  ;;  %v106_v55 = vmul.f32 %v100_v41, %v90_v51  ;;  %v157_v56 = vpack.c.bf16 %v120_v53, %v119_v52 }
 0x167   :  { %v121_v57 = vadd.f32 %v112_v45, %v105_v54  ;;  %v122_v58 = vadd.f32 %v116_v46, %v106_v55  ;;  %135 = vst [vmem:[#allocation7] sm:$0xff] %v157_v56 }
 0x169   :  { %v158_v59 = vpack.c.bf16 %v122_v58, %v121_v57 }
 0x16b   :  { %136 = vst [vmem:[#allocation7 + $0x8] sm:$0xff] %v158_v59 }
 0x16c   :  { %225 = shalt.err (!%p222_p6)
}
 0x16d   :  { %s226_s20 = scalar_lea.hbm %s320_s4, 256 }
 0x16e   :  { %p227_p7 = scmp.ne.s32.totalorder %s320_s4, %s226_s20  ;;  %p230_p8 = scmp.lt.u32.totalorder %s226_s20, %s320_s4 }
 0x170   :  { %p232_p9 = pnand %p230_p8, %p227_p7 }
 0x172   :  { %235 = shalt.err (!%p232_p9)
}
 0x173   :  { %s247_s25 = smov 128   ;;  %s248_s26 = smov 8  }
 0x174   :  { %148 = dma.vmem_to_hbm [thread:$0]  %s143_s17, 256, %s320_s4, [#allocation4], %s247_s25, %s247_s25, %s248_s26  }
 0x175   :  { %240 = dma.done.wait [#allocation4], 256  }
 0x176   :  { %241 = vsyncadd [#allocation4], 4294967040 }
 0x177   :  { %152 = vsyncpa [#allocation3], 1 }
 0x178   :  { %153 = vsyncpa [#allocation6], 1 }
 0x179   :  { %154 = vsyncpa [#allocation4], 1 }

</bundles_post_ra>
